<compile_context>
chip_gen: v5e
topology: v5e:2x2
jax: 0.10.0
libtpu: 0.0.40
codegen_flags: <defaults>
</compile_context>

<pallas_src>
import functools
import math

import jax
import jax.numpy as jnp
from jax.experimental import pallas as pl
from jax.experimental.pallas import tpu as pltpu


def _round_up(n: int, m: int) -> int:
    return ((n + m - 1) // m) * m


def _pad_to(arr, shape):
    pads = [(0, s - d) for d, s in zip(arr.shape, shape)]
    return jnp.pad(arr, pads)


def _policy_kernel(x_ref, w1_ref, w2_ref, w3_ref, b_ref, out_ref, *,
                   h_p, num_outputs):
    # One (TM, IN_P) f32 activation tile per grid step; weights/biases are
    # VMEM-resident f32.  Matmuls on the MXU with f32 accumulation; bias-add /
    # relu on the VPU, sigmoid on the EUP.
    x = x_ref[...]                               # f32 (TM, IN_P)
    b1 = b_ref[0:1, :h_p]                        # f32 (1, H_P)
    b2 = b_ref[1:2, :h_p]                        # f32 (1, H_P)
    b3 = b_ref[2:3, :num_outputs]                # f32 (1, NUM_OUT)

    h1 = jnp.dot(x, w1_ref[...], preferred_element_type=jnp.float32)
    h1 = jnp.maximum(h1 + b1, 0.0)               # relu

    h2 = jnp.dot(h1, w2_ref[...], preferred_element_type=jnp.float32)
    h2 = jnp.maximum(h2 + b2, 0.0)               # relu

    logits = jnp.dot(h2, w3_ref[...], preferred_element_type=jnp.float32) + b3
    out_ref[...] = jax.nn.sigmoid(logits).astype(out_ref.dtype)


def prepare_policy_params(params):
    """One-time prep: pad weights on the hidden dim, pack biases.

    params: (w1, b1, w2, b2, w3, b3) with weights (in, out) and biases (1, out)
            (transposed vs. PyTorch's nn.Linear storage).
    Returns (w1_p, w2_p, w3_p, b_all) — f32, hidden dim padded to 128, the
    contraction (input) dim padded only to a multiple of 8, and the output dim
    of w3 left UNPADDED so the kernel writes only the useful lanes to HBM.
    """
    w1, b1, w2, b2, w3, b3 = params
    num_inputs, hidden = w1.shape
    num_outputs = w3.shape[1]

    in_p = _round_up(num_inputs, 8)          # contraction dim (sublane align)
    h_p = _round_up(hidden, 128)             # hidden never touches HBM
    f_p = max(h_p, _round_up(num_outputs, 128))

    w1_p = _pad_to(w1.astype(jnp.float32), (in_p, h_p))
    w2_p = _pad_to(w2.astype(jnp.float32), (h_p, h_p))
    w3_p = _pad_to(w3.astype(jnp.float32), (h_p, num_outputs))

    b_all = jnp.zeros((3, f_p), jnp.float32)
    b_all = b_all.at[0, :hidden].set(b1.reshape(-1).astype(jnp.float32))
    b_all = b_all.at[1, :hidden].set(b2.reshape(-1).astype(jnp.float32))
    b_all = b_all.at[2, :num_outputs].set(b3.reshape(-1).astype(jnp.float32))
    return (w1_p, w2_p, w3_p, b_all)


@functools.partial(jax.jit, static_argnames=("tm",))
def policy_forward(x, prepared, *, tm=None):
    """Run the Policy MLP forward pass as a single batched Pallas kernel.

    x:        (batch, num_inputs) f32
    prepared: output of prepare_policy_params(params)
    Returns (batch, num_outputs) f32 probabilities.
    """
    w1_p, w2_p, w3_p, b_all = prepared
    batch, num_inputs = x.shape
    in_p, h_p = w1_p.shape
    num_outputs = w3_p.shape[1]
    f_p = b_all.shape[1]

    # Batch tile: multiple of 8 sublanes, capped at 1024 rows; clamp so the
    # grid has >=2 steps whenever possible (lets "parallel" batch sharding use
    # both TensorCores on v7x; harmless on single-TC v5e/v6e).
    b8 = _round_up(batch, 8)
    if tm is None:
        tm = min(b8, 1024)
        if b8 >= 16:
            tm = min(tm, _round_up((b8 + 1) // 2, 8))
    else:
        tm = _round_up(tm, 8)
    b_pad = _round_up(batch, tm)

    # Row-pad only when batch isn't a tile multiple, lane-pad only when
    # num_inputs isn't already 8-aligned.  For aligned shapes this is a no-op
    # (no extra HBM pass over x).  Padded rows/lanes are inert (zero weights)
    # and sliced off below.
    x_p = x
    if (b_pad, in_p) != (batch, num_inputs):
        x_p = _pad_to(x, (b_pad, in_p))

    kernel = functools.partial(_policy_kernel, h_p=h_p, num_outputs=num_outputs)
    grid = (b_pad // tm,)

    out = pl.pallas_call(
        kernel,
        out_shape=jax.ShapeDtypeStruct((b_pad, num_outputs), jnp.float32),
        grid_spec=pltpu.PrefetchScalarGridSpec(
            num_scalar_prefetch=0,
            grid=grid,
            in_specs=[
                pl.BlockSpec((tm, in_p), lambda i: (i, 0)),          # x tile
                pl.BlockSpec((in_p, h_p), lambda i: (0, 0)),         # w1 (resident)
                pl.BlockSpec((h_p, h_p), lambda i: (0, 0)),          # w2 (resident)
                pl.BlockSpec((h_p, num_outputs), lambda i: (0, 0)),  # w3 (resident)
                pl.BlockSpec((3, f_p), lambda i: (0, 0)),            # packed biases
            ],
            out_specs=pl.BlockSpec((tm, num_outputs), lambda i: (i, 0)),
        ),
        compiler_params=pltpu.CompilerParams(
            dimension_semantics=("parallel",)),
    )(x_p, w1_p, w2_p, w3_p, b_all)

    if b_pad != batch:
        out = out[:batch]
    return out


def init_policy_params(key, num_inputs, num_outputs, hidden_dim):
    """Deterministic init mirroring nn.Linear default (uniform ±1/sqrt(fan_in)).

    Weights are stored transposed relative to PyTorch: (in, out).
    Biases are stored as (1, out).
    """
    keys = jax.random.split(key, 6)

    def linear(kw, kb, fan_in, fan_out):
        bound = 1.0 / math.sqrt(fan_in)
        w = jax.random.uniform(kw, (fan_in, fan_out), jnp.float32,
                               minval=-bound, maxval=bound)
        b = jax.random.uniform(kb, (1, fan_out), jnp.float32,
                               minval=-bound, maxval=bound)
        return w, b

    w1, b1 = linear(keys[0], keys[1], num_inputs, hidden_dim)
    w2, b2 = linear(keys[2], keys[3], hidden_dim, hidden_dim)
    w3, b3 = linear(keys[4], keys[5], hidden_dim, num_outputs)
    return (w1, b1, w2, b2, w3, b3)


def policy_forward_ref_f32(x, params):
    """Pure-JAX f32 reference (exact PyTorch semantics, highest precision)."""
    w1, b1, w2, b2, w3, b3 = params
    hi = jax.lax.Precision.HIGHEST
    h1 = jnp.maximum(jnp.dot(x, w1, precision=hi) + b1, 0.0)
    h2 = jnp.maximum(jnp.dot(h1, w2, precision=hi) + b2, 0.0)
    return jax.nn.sigmoid(jnp.dot(h2, w3, precision=hi) + b3)


if __name__ == "__main__":
    # Small shapes consistent with Policy(num_inputs, num_outputs, hidden_dim).
    batch = 64
    num_inputs = 16
    num_outputs = 8
    hidden_dim = 32

    key = jax.random.PRNGKey(0)
    kx, kp = jax.random.split(key)
    x = jax.random.normal(kx, (batch, num_inputs), jnp.float32)
    params = init_policy_params(kp, num_inputs, num_outputs, hidden_dim)

    prepared = prepare_policy_params(params)   # one-time weight prep
    out = policy_forward(x, prepared)
    out = jax.block_until_ready(out)

    assert out.shape == (batch, num_outputs)

    # Whole compute path is f32 (weights VMEM-resident in f32, f32 MXU
    # accumulation), so the kernel matches the exact PyTorch f32 semantics up
    # to matmul rounding.
    ref_f32 = policy_forward_ref_f32(x, params)
    assert jnp.allclose(out, ref_f32, atol=2e-2, rtol=2e-2)

    print("KERNEL_OK")
</pallas_src>

<mosaic_0001>
module attributes {stable_mosaic.version = 11 : i64} {
  func.func @_policy_kernel(%arg0: i32, %arg1: memref<32x16xf32, #tpu.memory_space<vmem>>, %arg2: memref<16x128xf32, #tpu.memory_space<vmem>>, %arg3: memref<128x128xf32, #tpu.memory_space<vmem>>, %arg4: memref<128x8xf32, #tpu.memory_space<vmem>>, %arg5: memref<3x128xf32, #tpu.memory_space<vmem>>, %arg6: memref<32x8xf32, #tpu.memory_space<vmem>>) attributes {dimension_semantics = [#tpu.dimension_semantics<parallel>], iteration_bounds = array<i64: 2>, scalar_prefetch = 0 : i64, scratch_operands = 0 : i64, tpu.core_type = #tpu.core_type<tc>, window_params = [{transform_indices = @transform_0, window_bounds = array<i64: 32, 16>}, {pipeline_mode = #tpu.pipeline_mode<synchronous>, transform_indices = @transform_1, window_bounds = array<i64: 16, 128>}, {pipeline_mode = #tpu.pipeline_mode<synchronous>, transform_indices = @transform_2, window_bounds = array<i64: 128, 128>}, {pipeline_mode = #tpu.pipeline_mode<synchronous>, transform_indices = @transform_3, window_bounds = array<i64: 128, 8>}, {pipeline_mode = #tpu.pipeline_mode<synchronous>, transform_indices = @transform_4, window_bounds = array<i64: 3, 128>}, {transform_indices = @transform_5, window_bounds = array<i64: 32, 8>}]} {
    %c0 = arith.constant 0 : index
    %c0_0 = arith.constant 0 : index
    %0 = vector.load %arg1[%c0, %c0_0] : memref<32x16xf32, #tpu.memory_space<vmem>>, vector<32x16xf32>
    %c0_1 = arith.constant 0 : index
    %c0_2 = arith.constant 0 : index
    %1 = vector.load %arg5[%c0_1, %c0_2] : memref<3x128xf32, #tpu.memory_space<vmem>>, vector<1x128xf32>
    %c1 = arith.constant 1 : index
    %c0_3 = arith.constant 0 : index
    %2 = vector.load %arg5[%c1, %c0_3] : memref<3x128xf32, #tpu.memory_space<vmem>>, vector<1x128xf32>
    %c2 = arith.constant 2 : index
    %c0_4 = arith.constant 0 : index
    %3 = vector.load %arg5[%c2, %c0_4] : memref<3x128xf32, #tpu.memory_space<vmem>>, vector<1x8xf32>
    %c0_5 = arith.constant 0 : index
    %c0_6 = arith.constant 0 : index
    %4 = vector.load %arg2[%c0_5, %c0_6] : memref<16x128xf32, #tpu.memory_space<vmem>>, vector<16x128xf32>
    %cst = arith.constant dense<0.000000e+00> : vector<32x128xf32>
    %5 = tpu.matmul %0, %4, %cst {dimension_numbers = #tpu.dot_dimension_numbers<[1], [0], [0], [1], [0, 0, 1, 1], [], []>} : vector<32x16xf32>, vector<16x128xf32>, vector<32x128xf32> -> vector<32x128xf32>
    %6 = vector.broadcast %1 : vector<1x128xf32> to vector<32x128xf32>
    %7 = arith.addf %5, %6 : vector<32x128xf32>
    %cst_7 = arith.constant 0.000000e+00 : f32
    %8 = vector.broadcast %cst_7 : f32 to vector<32x128xf32>
    %9 = arith.maximumf %7, %8 : vector<32x128xf32>
    %c0_8 = arith.constant 0 : index
    %c0_9 = arith.constant 0 : index
    %10 = vector.load %arg3[%c0_8, %c0_9] : memref<128x128xf32, #tpu.memory_space<vmem>>, vector<128x128xf32>
    %cst_10 = arith.constant dense<0.000000e+00> : vector<32x128xf32>
    %11 = tpu.matmul %9, %10, %cst_10 {dimension_numbers = #tpu.dot_dimension_numbers<[1], [0], [0], [1], [0, 0, 1, 1], [], []>} : vector<32x128xf32>, vector<128x128xf32>, vector<32x128xf32> -> vector<32x128xf32>
    %12 = vector.broadcast %2 : vector<1x128xf32> to vector<32x128xf32>
    %13 = arith.addf %11, %12 : vector<32x128xf32>
    %cst_11 = arith.constant 0.000000e+00 : f32
    %14 = vector.broadcast %cst_11 : f32 to vector<32x128xf32>
    %15 = arith.maximumf %13, %14 : vector<32x128xf32>
    %c0_12 = arith.constant 0 : index
    %c0_13 = arith.constant 0 : index
    %16 = vector.load %arg4[%c0_12, %c0_13] : memref<128x8xf32, #tpu.memory_space<vmem>>, vector<128x8xf32>
    %cst_14 = arith.constant dense<0.000000e+00> : vector<32x8xf32>
    %17 = tpu.matmul %15, %16, %cst_14 {dimension_numbers = #tpu.dot_dimension_numbers<[1], [0], [0], [1], [0, 0, 1, 1], [], []>} : vector<32x128xf32>, vector<128x8xf32>, vector<32x8xf32> -> vector<32x8xf32>
    %18 = vector.broadcast %3 : vector<1x8xf32> to vector<32x8xf32>
    %19 = arith.addf %17, %18 : vector<32x8xf32>
    %20 = arith.negf %19 : vector<32x8xf32>
    %21 = math.exp %20 : vector<32x8xf32>
    %cst_15 = arith.constant 1.000000e+00 : f32
    %22 = vector.broadcast %cst_15 : f32 to vector<32x8xf32>
    %23 = arith.addf %22, %21 : vector<32x8xf32>
    %24 = arith.divf %22, %23 : vector<32x8xf32>
    %c0_16 = arith.constant 0 : index
    %c0_17 = arith.constant 0 : index
    %25 = vector.load %arg6[%c0_16, %c0_17] : memref<32x8xf32, #tpu.memory_space<vmem>>, vector<32x8xf32>
    tpu.vector_store %arg6[%c0_16, %c0_17], %24 {strides = array<i32>} : memref<32x8xf32, #tpu.memory_space<vmem>>, vector<32x8xf32>,
    return
  }
  func.func @transform_0(%arg0: i32) -> (i32, i32) {
    %c0_i32 = arith.constant 0 : i32
    %c0_i32_0 = arith.constant 0 : i32
    return %arg0, %c0_i32 : i32, i32
  }
  func.func @transform_1(%arg0: i32) -> (i32, i32) {
    %c0_i32 = arith.constant 0 : i32
    %c0_i32_0 = arith.constant 0 : i32
    %c0_i32_1 = arith.constant 0 : i32
    return %c0_i32, %c0_i32_0 : i32, i32
  }
  func.func @transform_2(%arg0: i32) -> (i32, i32) {
    %c0_i32 = arith.constant 0 : i32
    %c0_i32_0 = arith.constant 0 : i32
    %c0_i32_1 = arith.constant 0 : i32
    return %c0_i32, %c0_i32_0 : i32, i32
  }
  func.func @transform_3(%arg0: i32) -> (i32, i32) {
    %c0_i32 = arith.constant 0 : i32
    %c0_i32_0 = arith.constant 0 : i32
    %c0_i32_1 = arith.constant 0 : i32
    return %c0_i32, %c0_i32_0 : i32, i32
  }
  func.func @transform_4(%arg0: i32) -> (i32, i32) {
    %c0_i32 = arith.constant 0 : i32
    %c0_i32_0 = arith.constant 0 : i32
    %c0_i32_1 = arith.constant 0 : i32
    return %c0_i32, %c0_i32_0 : i32, i32
  }
  func.func @transform_5(%arg0: i32) -> (i32, i32) {
    %c0_i32 = arith.constant 0 : i32
    %c0_i32_0 = arith.constant 0 : i32
    return %arg0, %c0_i32 : i32, i32
  }
}

</mosaic_0001>

<bundles_post_ra>
// kernel: policy_forward.1
= control target key start
LH: loop header
LB: loop body
LE: loop exit
PB: predicated region body
PF: predicated region fallthrough
CT: control target
= control target key end

     0   :  { %s633_s18 = smov 0   ;;  %s788_s0 = inlined_call_operand.vmem [shape: f32[64,16], index: 0, kind: input, shape index: {}]   ;;  %s789_s1 = inlined_call_operand.vmem [shape: f32[16,128], index: 1, kind: input, shape index: {}]   ;;  %s790_s2 = inlined_call_operand.vmem [shape: f32[128,128], index: 2, kind: input, shape index: {}]   ;;  %s791_s3 = inlined_call_operand.vmem [shape: f32[128,8], index: 3, kind: input, shape index: {}]   ;;  %s792_s4 = inlined_call_operand.vmem [shape: f32[3,128], index: 4, kind: input, shape index: {}]   ;;  %s793_s5 = inlined_call_operand.vmem [shape: f32[64,8], index: 5, kind: output, shape index: {}]  }
   0x1 LB: > { %s517_s19 = sadd.s32 4294967295, %s601_s18   ;;  %p521_p0 = scmp.ge.s32.totalorder %s601_s18, 1  ;;  %s601_s18 = sphi %s633_s18, %s15_s18  }
   0x2   : > { %p188_p1 = scmp.lt.s32.totalorder %s601_s18, 3 }
   0x4   : > { %p189_p2 = pnand %p521_p0, %p188_p1 }
   0x5   : > { %s522_s24 = sshll.u32 (!%p189_p2), %s517_s19, 2 }
   0x6   : > { %192 = sbr.rel (%p189_p2) target bundleno = 468 (0x1d4), region = 40  ;;  %p217_p3 = scmp.lt.s32.totalorder (!%p189_p2), %s522_s24, 7 }
   0xb   : > { %v236_v0 = vld [vmem:[%s789_s1 + $0x8] sm:$0xff]  ;;  %v235_v1 = vld [vmem:[%s789_s1] sm:$0xff]  ;;  %v299_v2 = vld [vmem:[%s790_s2 + $0x78] sm:$0xff]  ;;  %s795_s24 = smov (!%p217_p3, %s522_s24), 7  ;;  %vm238_vm0 = vcmask 130048   ;;  %vm456_vm4 = vcmask 64512  }
   0xc   : > { %265 = vmatpush.msra.mxu0 %v236_v0  ;;  %301 = vmatpush.msra.mxu1 %v299_v2  ;;  %v298_v3 = vld [vmem:[%s790_s2 + $0x70] sm:$0xff]  ;;  %v297_v4 = vld [vmem:[%s790_s2 + $0x68] sm:$0xff]  ;;  %v296_v5 = vld [vmem:[%s790_s2 + $0x60] sm:$0xff]  ;;  %s523_s8 = sshll.u32 %s795_s24, 3 }
   0xd   : > { %536 = vmatpush.msra.mxu3 %v299_v2  ;;  %s667_s11 = scalar_lea.vmem %s788_s0, %s523_s8  ;;  %v295_v6 = vld [vmem:[%s790_s2 + $0x58] sm:$0xff]  ;;  %v294_v8 = vld [vmem:[%s790_s2 + $0x50] sm:$0xff]  ;;  %v293_v9 = vld [vmem:[%s790_s2 + $0x48] sm:$0xff]  ;;  %s775_s10 = scalar_lea.vmem %s793_s5, %s523_s8 }
   0xe   : > { %266 = vmatpush.msra.mxu0 %v235_v1  ;;  %302 = vmatpush.msra.mxu1 %v298_v3  ;;  %v228_v7 = vld [vmem:[%s667_s11] sm:$0xff]  ;;  %v229_v11 = vld [vmem:[%s667_s11 + $0x8] sm:$0xff]  ;;  %v291_v12 = vld [vmem:[%s790_s2 + $0x38] sm:$0xff] }
   0xf   : > { %537 = vmatpush.msra.mxu3 %v298_v3  ;;  %526 = vmatmul.msk.f32.vlgmr.msra.gmra.mxu0 %vm238_vm0, %v228_v7  ;;  %v292_v10 = vld [vmem:[%s790_s2 + $0x40] sm:$0xff]  ;;  %v290_v13 = vld [vmem:[%s790_s2 + $0x30] sm:$0xff]  ;;  %v289_v14 = vld [vmem:[%s790_s2 + $0x28] sm:$0xff] }
  0x10   : > { %303 = vmatpush.msra.mxu1 %v297_v4  ;;  %v288_v15 = vld [vmem:[%s790_s2 + $0x20] sm:$0xff]  ;;  %v230_v16 = vld [vmem:[%s667_s11 + $0x10] sm:$0xff]  ;;  %v287_v17 = vld [vmem:[%s790_s2 + $0x18] sm:$0xff] }
  0x11   : > { %538 = vmatpush.msra.mxu3 %v297_v4  ;;  %v231_v18 = vld [vmem:[%s667_s11 + $0x18] sm:$0xff]  ;;  %v286_v19 = vld [vmem:[%s790_s2 + $0x10] sm:$0xff]  ;;  %v285_v20 = vld [vmem:[%s790_s2 + $0x8] sm:$0xff] }
  0x12   : > { %304 = vmatpush.msra.mxu1 %v296_v5  ;;  %v284_v21 = vld [vmem:[%s790_s2] sm:$0xff]  ;;  %v349_v23 = vld [vmem:[%s791_s3 + $0x78] sm:$0xff]  ;;  %v348_v24 = vld [vmem:[%s791_s3 + $0x70] sm:$0xff] }
  0x13   : > { %539 = vmatpush.msra.mxu3 %v296_v5  ;;  %v576_v22 = vld [vmem:[%s792_s4] ss:$0 sm:$0xff]  ;;  %351 = vmatpush.msrb.mxu0 %v349_v23  ;;  %v347_v25 = vld [vmem:[%s791_s3 + $0x68] sm:$0xff]  ;;  %v345_v30 = vld [vmem:[%s791_s3 + $0x58] sm:$0xff] }
  0x14   : > { %305 = vmatpush.msra.mxu1 %v295_v6  ;;  %552 = vmatpush.msra.mxu2 %v349_v23  ;;  %v346_v28 = vld [vmem:[%s791_s3 + $0x60] sm:$0xff]  ;;  %v344_v31 = vld [vmem:[%s791_s3 + $0x50] sm:$0xff]  ;;  %v343_v32 = vld [vmem:[%s791_s3 + $0x48] sm:$0xff] }
  0x15   : > { %540 = vmatpush.msra.mxu3 %v295_v6  ;;  %352 = vmatpush.msrb.mxu0 %v348_v24  ;;  %v342_v35 = vld [vmem:[%s791_s3 + $0x40] sm:$0xff]  ;;  %v341_v37 = vld [vmem:[%s791_s3 + $0x38] sm:$0xff]  ;;  %v340_v38 = vld [vmem:[%s791_s3 + $0x30] sm:$0xff] }
  0x16   : > { %306 = vmatpush.msra.mxu1 %v294_v8  ;;  %553 = vmatpush.msra.mxu2 %v348_v24  ;;  %v339_v39 = vld [vmem:[%s791_s3 + $0x28] sm:$0xff]  ;;  %v338_v42 = vld [vmem:[%s791_s3 + $0x20] sm:$0xff]  ;;  %v337_v44 = vld [vmem:[%s791_s3 + $0x18] sm:$0xff] }
  0x17   : > { %541 = vmatpush.msra.mxu3 %v294_v8  ;;  %527 = vmatmul.msk.f32.gmra.mxu0 %vm238_vm0, %v229_v11  ;;  %v336_v48 = vld [vmem:[%s791_s3 + $0x10] sm:$0xff]  ;;  %v335_v49 = vld [vmem:[%s791_s3 + $0x8] sm:$0xff]  ;;  %v334_v50 = vld [vmem:[%s791_s3] sm:$0xff] }
  0x18   : > { %307 = vmatpush.msra.mxu1 %v293_v9  ;;  %353 = vmatpush.msrb.mxu0 %v347_v25  ;;  %v577_v51 = vld [vmem:[%s792_s4 + $0x1] ss:$0 sm:$0xff]  ;;  %v578_v0 = vld [vmem:[%s792_s4 + $0x2] ss:$0 sm:$0xff] }
  0x19   : > { %542 = vmatpush.msra.mxu3 %v293_v9  ;;  %554 = vmatpush.msra.mxu2 %v347_v25 }
  0x1a   : > { %308 = vmatpush.msra.mxu1 %v292_v10  ;;  %354 = vmatpush.msrb.mxu0 %v346_v28 }
  0x1b   : > { %543 = vmatpush.msra.mxu3 %v292_v10  ;;  %555 = vmatpush.msra.mxu2 %v346_v28 }
  0x1c   : > { %309 = vmatpush.msra.mxu1 %v291_v12  ;;  %355 = vmatpush.msrb.mxu0 %v345_v30 }
  0x1d   : > { %544 = vmatpush.msra.mxu3 %v291_v12  ;;  %556 = vmatpush.msra.mxu2 %v345_v30 }
  0x1e   : > { %310 = vmatpush.msra.mxu1 %v290_v13  ;;  %356 = vmatpush.msrb.mxu0 %v344_v31 }
  0x1f   : > { %545 = vmatpush.msra.mxu3 %v290_v13  ;;  %528 = vmatmul.msk.f32.gmra.mxu0 %vm238_vm0, %v230_v16 }
  0x20   : > { %311 = vmatpush.msra.mxu1 %v289_v14  ;;  %557 = vmatpush.msra.mxu2 %v344_v31 }
  0x21   : > { %546 = vmatpush.msra.mxu3 %v289_v14  ;;  %357 = vmatpush.msrb.mxu0 %v343_v32 }
  0x22   : > { %312 = vmatpush.msra.mxu1 %v288_v15  ;;  %558 = vmatpush.msra.mxu2 %v343_v32 }
  0x23   : > { %547 = vmatpush.msra.mxu3 %v288_v15  ;;  %358 = vmatpush.msrb.mxu0 %v342_v35 }
  0x24   : > { %313 = vmatpush.msra.mxu1 %v287_v17  ;;  %559 = vmatpush.msra.mxu2 %v342_v35 }
  0x25   : > { %548 = vmatpush.msra.mxu3 %v287_v17  ;;  %359 = vmatpush.msrb.mxu0 %v341_v37 }
  0x26   : > { %314 = vmatpush.msra.mxu1 %v286_v19  ;;  %560 = vmatpush.msra.mxu2 %v341_v37 }
  0x27   : > { %529 = vmatmul.msk.f32.gmra.mxu0 %vm238_vm0, %v231_v18  ;;  %549 = vmatpush.msra.mxu3 %v286_v19 }
  0x28   : > { %315 = vmatpush.msra.mxu1 %v285_v20  ;;  %360 = vmatpush.msrb.mxu0 %v340_v38 }
  0x29   : > { %550 = vmatpush.msra.mxu3 %v285_v20  ;;  %561 = vmatpush.msra.mxu2 %v340_v38 }
  0x2a   : > { %316 = vmatpush.msra.mxu1 %v284_v21  ;;  %361 = vmatpush.msrb.mxu0 %v339_v39 }
  0x2b   : > { %551 = vmatpush.msra.mxu3 %v284_v21  ;;  %562 = vmatpush.msra.mxu2 %v339_v39 }
  0x2c   : > { %362 = vmatpush.msrb.mxu0 %v338_v42 }
  0x2d   : > { %563 = vmatpush.msra.mxu2 %v338_v42 }
  0x2e   : > { %363 = vmatpush.msrb.mxu0 %v337_v44 }
  0x2f   : > { %564 = vmatpush.msra.mxu2 %v337_v44 }
  0x30   : > { %364 = vmatpush.msrb.mxu0 %v336_v48 }
  0x31   : > { %565 = vmatpush.msra.mxu2 %v336_v48 }
  0x32   : > { %365 = vmatpush.msrb.mxu0 %v335_v49 }
  0x33   : > { %566 = vmatpush.msra.mxu2 %v335_v49 }
  0x34   : > { %366 = vmatpush.msrb.mxu0 %v334_v50 }
  0x35   : > { %567 = vmatpush.msra.mxu2 %v334_v50 }
  0x8c   : > { %v268_v26 = vpop.f32.mrf.mxu0 }
  0x8d   : > { %v269_v27 = vadd.f32 %v576_v22, %v268_v26 }
  0x8f   : > { %v280_v29 = vmax.f32 %v269_v27, 0.0 }
  0x91   : > { %317 = vmatmul.f32.vlgmr.msra.gmra.mxu1 %v280_v29 }
  0x94   : > { %v271_v33 = vpop.f32.mrf.mxu0 }
  0x95   : > { %v272_v34 = vadd.f32 %v576_v22, %v271_v33 }
  0x97   : > { %v281_v36 = vmax.f32 %v272_v34, 0.0 }
  0x99   : > { %320 = vmatmul.f32.vlgmr.msra.gmra.mxu3 %v281_v36 }
  0x9c   : > { %v274_v40 = vpop.f32.mrf.mxu0 }
  0x9d   : > { %v275_v41 = vadd.f32 %v576_v22, %v274_v40 }
  0x9f   : > { %v282_v43 = vmax.f32 %v275_v41, 0.0 }
  0xa1   : > { %323 = vmatmul.f32.gmra.mxu3 %v282_v43 }
  0xa4   : > { %v277_v45 = vpop.f32.mrf.mxu0 }
  0xa5   : > { %v278_v46 = vadd.f32 %v576_v22, %v277_v45 }
  0xa7   : > { %v283_v47 = vmax.f32 %v278_v46, 0.0 }
  0xa9   : > { %326 = vmatmul.f32.gmra.mxu3 %v283_v47 }
 0x10e   : > { %v318_v52 = vpop.f32.mrf.mxu1 }
 0x10f   : > { %v319_v53 = vadd.f32 %v577_v51, %v318_v52 }
 0x111   : > { %v330_v54 = vmax.f32 %v319_v53, 0.0 }
 0x113   : > { %367 = vmatmul.f32.vlgmr.msrb.gmra.mxu0 %v330_v54 }
 0x11c   : > { %v321_v55 = vpop.f32.mrf.mxu3 }
 0x11d   : > { %v322_v56 = vadd.f32 %v577_v51, %v321_v55 }
 0x11f   : > { %v331_v57 = vmax.f32 %v322_v56, 0.0 }
 0x121   : > { %370 = vmatmul.f32.vlgmr.msra.gmra.mxu2 %v331_v57 }
 0x124   : > { %v324_v58 = vpop.f32.mrf.mxu3 }
 0x125   : > { %v325_v59 = vadd.f32 %v577_v51, %v324_v58 }
 0x127   : > { %v332_v60 = vmax.f32 %v325_v59, 0.0 }
 0x129   : > { %373 = vmatmul.f32.gmra.mxu2 %v332_v60 }
 0x12c   : > { %v327_v61 = vpop.f32.mrf.mxu3 }
 0x12d   : > { %v328_v62 = vadd.f32 %v577_v51, %v327_v61 }
 0x12f   : > { %v333_v63 = vmax.f32 %v328_v62, 0.0 }
 0x131   : > { %376 = vmatmul.f32.gmra.mxu2 %v333_v63 }
 0x190   : > { %v368_v1 = vpop.f32.mrf.mxu0 }
 0x191   : > { %v369_v2 = vadd.f32 %v578_v0, %v368_v1 }
 0x193   : > { %v530_v3 = vmul.f32 -1.442695, %v369_v2 }
 0x195   : > { %579 = vpow2.f32 %v530_v3 }
 0x19b   : > { %v580_v4 = vpop.eup %579 }
 0x19c   : > { %v392_v5 = vadd.f32 1.0, %v580_v4 }
 0x19e   : > { %581 = vrcp.f32 %v392_v5  ;;  %v407_v12 = vand.u32 2147483648, %v392_v5  ;;  %v405_v14 = vand.u32 2147483647, %v392_v5  ;;  %vm401_vm2 = vweird.f32 %v392_v5 }
 0x1a0   : > { %v408_v16 = vor.u32 1.1754944e-38, %v407_v12  ;;  %vm406_vm5 = vcmp.eq.f32.partialorder %v405_v14, 8.507059e+37 }
 0x1a4   : > { %v582_v6 = vpop.eup %581  ;;  %v371_v7 = vpop.f32.mrf.mxu2 }
 0x1a5   : > { %v397_v8 = vmul.f32 %v582_v6, %v392_v5  ;;  %v372_v9 = vadd.f32 %v578_v0, %v371_v7  ;;  %vm402_vm1 = vweird.f32 %v582_v6 }
 0x1a6   : > { %vm403_vm3 = vmor %vm401_vm2, %vm402_vm1 }
 0x1a7   : > { %v398_v10 = vsub.f32 1.0, %v397_v8  ;;  %v531_v11 = vmul.f32 -1.442695, %v372_v9 }
 0x1a9   : > { %v399_v13 = vmul.f32 %v582_v6, %v398_v10  ;;  %583 = vpow2.f32 %v531_v11 }
 0x1ab   : > { %v400_v15 = vadd.f32 %v582_v6, %v399_v13 }
 0x1ac   : > { %v374_v17 = vpop.f32.mrf.mxu2 }
 0x1ad   : > { %v404_v18 = vsel %vm403_vm3, %v582_v6, %v400_v15  ;;  %v375_v19 = vadd.f32 %v578_v0, %v374_v17 }
 0x1ae   : > { %v409_v20 = vsel %vm406_vm5, %v408_v16, %v404_v18 }
 0x1af   : > { %v584_v21 = vpop.eup %583  ;;  %457 = vst.msk [vmem:[%s775_s10] sm:$0xff] %vm456_vm4, %v409_v20  ;;  %v532_v22 = vmul.f32 -1.442695, %v375_v19 }
 0x1b0   : > { %v393_v23 = vadd.f32 1.0, %v584_v21 }
 0x1b1   : > { %585 = vpow2.f32 %v532_v22 }
 0x1b2   : > { %587 = vrcp.f32 %v393_v23  ;;  %v422_v32 = vand.u32 2147483648, %v393_v23  ;;  %v420_v34 = vand.u32 2147483647, %v393_v23  ;;  %vm416_vm7 = vweird.f32 %v393_v23 }
 0x1b4   : > { %v377_v24 = vpop.f32.mrf.mxu2  ;;  %v423_v38 = vor.u32 1.1754944e-38, %v422_v32  ;;  %vm421_vm9 = vcmp.eq.f32.partialorder %v420_v34, 8.507059e+37 }
 0x1b5   : > { %v378_v25 = vadd.f32 %v578_v0, %v377_v24 }
 0x1b7   : > { %v586_v26 = vpop.eup %585  ;;  %v533_v27 = vmul.f32 -1.442695, %v378_v25 }
 0x1b8   : > { %v588_v28 = vpop.eup %587  ;;  %v394_v29 = vadd.f32 1.0, %v586_v26 }
 0x1b9   : > { %v412_v30 = vmul.f32 %v588_v28, %v393_v23  ;;  %589 = vpow2.f32 %v533_v27  ;;  %vm417_vm6 = vweird.f32 %v588_v28 }
 0x1ba   : > { %591 = vrcp.f32 %v394_v29  ;;  %vm418_vm8 = vmor %vm416_vm7, %vm417_vm6  ;;  %v437_v44 = vand.u32 2147483648, %v394_v29  ;;  %v435_v46 = vand.u32 2147483647, %v394_v29  ;;  %vm431_vm11 = vweird.f32 %v394_v29 }
 0x1bb   : > { %v413_v31 = vsub.f32 1.0, %v412_v30 }
 0x1bc   : > { %v438_v49 = vor.u32 1.1754944e-38, %v437_v44  ;;  %vm436_vm13 = vcmp.eq.f32.partialorder %v435_v46, 8.507059e+37 }
 0x1bd   : > { %v414_v33 = vmul.f32 %v588_v28, %v413_v31 }
 0x1bf   : > { %v590_v35 = vpop.eup %589  ;;  %v415_v36 = vadd.f32 %v588_v28, %v414_v33 }
 0x1c0   : > { %v592_v37 = vpop.eup %591  ;;  %v395_v39 = vadd.f32 1.0, %v590_v35 }
 0x1c1   : > { %v419_v40 = vsel %vm418_vm8, %v588_v28, %v415_v36  ;;  %v427_v41 = vmul.f32 %v592_v37, %v394_v29  ;;  %vm432_vm10 = vweird.f32 %v592_v37 }
 0x1c2   : > { %v424_v42 = vsel %vm421_vm9, %v423_v38, %v419_v40  ;;  %593 = vrcp.f32 %v395_v39  ;;  %vm433_vm12 = vmor %vm431_vm11, %vm432_vm10  ;;  %v452_v54 = vand.u32 2147483648, %v395_v39  ;;  %v450_v56 = vand.u32 2147483647, %v395_v39 }
 0x1c3   : > { %458 = vst.msk [vmem:[%s775_s10 + $0x8] sm:$0xff] %vm456_vm4, %v424_v42  ;;  %v428_v43 = vsub.f32 1.0, %v427_v41  ;;  %vm446_vm15 = vweird.f32 %v395_v39 }
 0x1c4   : > { %v453_v58 = vor.u32 1.1754944e-38, %v452_v54  ;;  %vm451_vm1 = vcmp.eq.f32.partialorder %v450_v56, 8.507059e+37 }
 0x1c5   : > { %v429_v45 = vmul.f32 %v592_v37, %v428_v43 }
 0x1c7   : > { %v430_v47 = vadd.f32 %v592_v37, %v429_v45 }
 0x1c8   : > { %v594_v48 = vpop.eup %593 }
 0x1c9   : > { %v434_v50 = vsel %vm433_vm12, %v592_v37, %v430_v47  ;;  %v442_v51 = vmul.f32 %v594_v48, %v395_v39  ;;  %vm447_vm14 = vweird.f32 %v594_v48 }
 0x1ca   : > { %v439_v52 = vsel %vm436_vm13, %v438_v49, %v434_v50  ;;  %vm448_vm0 = vmor %vm446_vm15, %vm447_vm14 }
 0x1cb   : > { %459 = vst.msk [vmem:[%s775_s10 + $0x10] sm:$0xff] %vm456_vm4, %v439_v52  ;;  %v443_v53 = vsub.f32 1.0, %v442_v51 }
 0x1cd   : > { %v444_v55 = vmul.f32 %v594_v48, %v443_v53 }
 0x1cf   : > { %v445_v57 = vadd.f32 %v594_v48, %v444_v55 }
 0x1d1   : > { %v449_v59 = vsel %vm448_vm0, %v594_v48, %v445_v57 }
 0x1d2   : > { %v454_v60 = vsel %vm451_vm1, %v453_v58, %v449_v59 }
 0x1d3   : > { %460 = vst.msk [vmem:[%s775_s10 + $0x18] sm:$0xff] %vm456_vm4, %v454_v60 }
 0x1d4 PF: > { %s15_s18 = sadd.s32 1, %s601_s18  }
 0x1d5   : > { %p12_p4 = scmp.ge.s32.totalorder %s15_s18, 4  }
 0x1d7   :  { %14 = sbr.rel (!%p12_p4) target bundleno = 1 (0x1), region = 70 }

</bundles_post_ra>
